<compile_context>
chip_gen: v6e
topology: v6e:2x2x1
jax: 0.10.0
libtpu: 0.0.40
codegen_flags: <defaults>
</compile_context>

<pallas_src>
import jax
import jax.numpy as jnp
from jax.experimental import pallas as pl
from jax.experimental.pallas import tpu as pltpu

K_IN = 784          # flattened 28x28 MNIST image
K_PAD = 896         # 7 * 128 : padded fc1 contraction dim
HID = 64
C_OUT = 10
C_PAD = 128         # lane-dense padded class dim
NEG_BIAS = -1e9     # padded-class bias -> exp() underflows to exactly 0 in f32


def _round_up(n, m):
    return ((n + m - 1) // m) * m


def _default_batch_tile():
    # Match the MXU systolic height: 256 on v6e/v7x, 128 on v5e/unknown.
    try:
        kind = jax.devices()[0].device_kind.lower()
        if "v6" in kind or "v7" in kind:
            return 256
    except Exception:
        pass
    return 128


def mlp_logsoftmax_kernel(x_ref,
                          w1_ref, b1_ref,
                          w2_ref, b2_ref,
                          w3_ref, b3_ref,
                          w4_ref, b4_ref,
                          out_ref):
    # x tile: (tb, K_PAD) bf16; all matmuls are bf16 x bf16 -> f32 (MXU).
    x = x_ref[...]

    h = jnp.dot(x, w1_ref[...], preferred_element_type=jnp.float32)
    h = jnp.maximum(h + b1_ref[...].astype(jnp.float32), 0.0)

    h = jnp.dot(h.astype(jnp.bfloat16), w2_ref[...],
                preferred_element_type=jnp.float32)
    h = jnp.maximum(h + b2_ref[...].astype(jnp.float32), 0.0)

    h = jnp.dot(h.astype(jnp.bfloat16), w3_ref[...],
                preferred_element_type=jnp.float32)
    h = jnp.maximum(h + b3_ref[...].astype(jnp.float32), 0.0)

    # fc4: padded to 128 output lanes; padded columns get bias = NEG_BIAS so
    # they contribute exp(...) == 0 to the softmax denominator.
    logits = jnp.dot(h.astype(jnp.bfloat16), w4_ref[...],
                     preferred_element_type=jnp.float32)
    logits = logits + b4_ref[...].astype(jnp.float32)

    # Numerically stable log_softmax over the class axis (f32, VPU + EUP).
    m = jnp.max(logits, axis=-1, keepdims=True)
    shifted = logits - m
    lse = jnp.log(jnp.sum(jnp.exp(shifted), axis=-1, keepdims=True))
    out_ref[...] = shifted - lse


def init_params(key):
    """Logical (unpadded) f32 params; weights stored (in, out) = PyTorch W.T."""
    dims = [(K_IN, HID), (HID, HID), (HID, HID), (HID, C_OUT)]
    params = {}
    keys = jax.random.split(key, 2 * len(dims))
    for i, (fan_in, fan_out) in enumerate(dims):
        bound = 1.0 / (fan_in ** 0.5)  # PyTorch default nn.Linear init scale
        wk, bk = keys[2 * i], keys[2 * i + 1]
        params[f"w{i + 1}"] = jax.random.uniform(
            wk, (fan_in, fan_out), jnp.float32, minval=-bound, maxval=bound)
        params[f"b{i + 1}"] = jax.random.uniform(
            bk, (1, fan_out), jnp.float32, minval=-bound, maxval=bound)
    return params


def prepare_params(params):
    """One-time wrapper-side prep: pad K (784->896) and classes (10->128),
    cast everything to bf16 for the MXU / half the HBM traffic."""
    w1 = jnp.zeros((K_PAD, HID), jnp.bfloat16)
    w1 = w1.at[:K_IN, :].set(params["w1"].astype(jnp.bfloat16))
    w4 = jnp.zeros((HID, C_PAD), jnp.bfloat16)
    w4 = w4.at[:, :C_OUT].set(params["w4"].astype(jnp.bfloat16))
    b4 = jnp.full((1, C_PAD), NEG_BIAS, jnp.bfloat16)
    b4 = b4.at[:, :C_OUT].set(params["b4"].astype(jnp.bfloat16))
    return {
        "w1": w1, "b1": params["b1"].astype(jnp.bfloat16),
        "w2": params["w2"].astype(jnp.bfloat16),
        "b2": params["b2"].astype(jnp.bfloat16),
        "w3": params["w3"].astype(jnp.bfloat16),
        "b3": params["b3"].astype(jnp.bfloat16),
        "w4": w4, "b4": b4,
    }


def net_forward(x, prepared, tb=None):
    """x: (B, 784) float32. prepared: output of prepare_params. Returns (B, 10) f32."""
    B = x.shape[0]
    if tb is None:
        tb = _default_batch_tile()
    # Don't burn a full MXU-height tile on a tiny demo batch, but keep the
    # sublane (8) alignment; at realistic batch sizes tb stays 128/256.
    tb = min(tb, _round_up(B, 8))
    b_pad = _round_up(B, tb)
    grid = (pl.cdiv(b_pad, tb),)

    # Pad batch to a tile multiple and features 784 -> 896; cast to bf16.
    x_p = jnp.zeros((b_pad, K_PAD), jnp.bfloat16)
    x_p = x_p.at[:B, :K_IN].set(x.astype(jnp.bfloat16))

    w1, b1 = prepared["w1"], prepared["b1"]
    w2, b2 = prepared["w2"], prepared["b2"]
    w3, b3 = prepared["w3"], prepared["b3"]
    w4, b4 = prepared["w4"], prepared["b4"]

    def resident(shape):
        # Same block for every grid step -> weights/biases stay in VMEM.
        return pl.BlockSpec(shape, lambda i: tuple(0 for _ in shape))

    in_specs = [
        pl.BlockSpec((tb, K_PAD), lambda i: (i, 0)),   # x, tiled over batch
        resident(w1.shape), resident(b1.shape),
        resident(w2.shape), resident(b2.shape),
        resident(w3.shape), resident(b3.shape),
        resident(w4.shape), resident(b4.shape),
    ]
    out_spec = pl.BlockSpec((tb, C_PAD), lambda i: (i, 0))  # lane-dense output

    out = pl.pallas_call(
        mlp_logsoftmax_kernel,
        out_shape=jax.ShapeDtypeStruct((b_pad, C_PAD), jnp.float32),
        grid=grid,
        in_specs=in_specs,
        out_specs=out_spec,
        compiler_params=pltpu.CompilerParams(
            dimension_semantics=("parallel",)),  # shards batch tiles across TCs on v7x
    )(x_p, w1, b1, w2, b2, w3, b3, w4, b4)

    return out[:B, :C_OUT]


def net_forward_ref(x, params):
    """Plain-JAX reference mimicking the kernel's numerics (bf16 inputs to the
    matmuls, f32 accumulation)."""
    def lin(h, w, b):
        y = jnp.dot(h.astype(jnp.bfloat16), w.astype(jnp.bfloat16),
                    preferred_element_type=jnp.float32)
        return y + b.astype(jnp.bfloat16).astype(jnp.float32)

    h = jnp.maximum(lin(x, params["w1"], params["b1"]), 0.0)
    h = jnp.maximum(lin(h, params["w2"], params["b2"]), 0.0)
    h = jnp.maximum(lin(h, params["w3"], params["b3"]), 0.0)
    logits = lin(h, params["w4"], params["b4"])
    return jax.nn.log_softmax(logits, axis=1)


if __name__ == "__main__":
    key = jax.random.PRNGKey(0)
    pkey, xkey = jax.random.split(key)

    params = init_params(pkey)
    prepared = prepare_params(params)

    B = 8  # small demo batch of flattened 28x28 MNIST images
    x = jax.random.normal(xkey, (B, K_IN), jnp.float32)

    out = net_forward(x, prepared)
    out = jax.block_until_ready(out)

    ref = net_forward_ref(x, params)
    assert out.shape == (B, C_OUT)
    assert jnp.allclose(out, ref, atol=2e-2, rtol=2e-2), "mismatch vs reference"
    # rows of log_softmax must exp-sum to 1 (padded classes contribute exactly 0)
    assert jnp.allclose(jnp.sum(jnp.exp(out), axis=1), 1.0, atol=1e-3)

    print("KERNEL_OK")
</pallas_src>

<mosaic_0001>
module attributes {stable_mosaic.version = 11 : i64} {
  func.func @mlp_logsoftmax_kernel(%arg0: i32, %arg1: memref<8x896xbf16, #tpu.memory_space<vmem>>, %arg2: memref<896x64xbf16, #tpu.memory_space<vmem>>, %arg3: memref<1x64xbf16, #tpu.memory_space<vmem>>, %arg4: memref<64x64xbf16, #tpu.memory_space<vmem>>, %arg5: memref<1x64xbf16, #tpu.memory_space<vmem>>, %arg6: memref<64x64xbf16, #tpu.memory_space<vmem>>, %arg7: memref<1x64xbf16, #tpu.memory_space<vmem>>, %arg8: memref<64x128xbf16, #tpu.memory_space<vmem>>, %arg9: memref<1x128xbf16, #tpu.memory_space<vmem>>, %arg10: memref<8x128xf32, #tpu.memory_space<vmem>>) attributes {dimension_semantics = [#tpu.dimension_semantics<parallel>], iteration_bounds = array<i64: 1>, scalar_prefetch = 0 : i64, scratch_operands = 0 : i64, tpu.core_type = #tpu.core_type<tc>, window_params = [{transform_indices = @transform_0, window_bounds = array<i64: 8, 896>}, {pipeline_mode = #tpu.pipeline_mode<synchronous>, transform_indices = @transform_1, window_bounds = array<i64: 896, 64>}, {pipeline_mode = #tpu.pipeline_mode<synchronous>, transform_indices = @transform_2, window_bounds = array<i64: 1, 64>}, {pipeline_mode = #tpu.pipeline_mode<synchronous>, transform_indices = @transform_3, window_bounds = array<i64: 64, 64>}, {pipeline_mode = #tpu.pipeline_mode<synchronous>, transform_indices = @transform_4, window_bounds = array<i64: 1, 64>}, {pipeline_mode = #tpu.pipeline_mode<synchronous>, transform_indices = @transform_5, window_bounds = array<i64: 64, 64>}, {pipeline_mode = #tpu.pipeline_mode<synchronous>, transform_indices = @transform_6, window_bounds = array<i64: 1, 64>}, {pipeline_mode = #tpu.pipeline_mode<synchronous>, transform_indices = @transform_7, window_bounds = array<i64: 64, 128>}, {pipeline_mode = #tpu.pipeline_mode<synchronous>, transform_indices = @transform_8, window_bounds = array<i64: 1, 128>}, {transform_indices = @transform_9, window_bounds = array<i64: 8, 128>}]} {
    %c0 = arith.constant 0 : index
    %c0_0 = arith.constant 0 : index
    %0 = vector.load %arg1[%c0, %c0_0] : memref<8x896xbf16, #tpu.memory_space<vmem>>, vector<8x896xbf16>
    %c0_1 = arith.constant 0 : index
    %c0_2 = arith.constant 0 : index
    %1 = vector.load %arg2[%c0_1, %c0_2] : memref<896x64xbf16, #tpu.memory_space<vmem>>, vector<896x64xbf16>
    %cst = arith.constant dense<0.000000e+00> : vector<8x64xf32>
    %2 = tpu.matmul %0, %1, %cst {dimension_numbers = #tpu.dot_dimension_numbers<[1], [0], [0], [1], [0, 0, 1, 1], [], []>} : vector<8x896xbf16>, vector<896x64xbf16>, vector<8x64xf32> -> vector<8x64xf32>
    %c0_3 = arith.constant 0 : index
    %c0_4 = arith.constant 0 : index
    %3 = vector.load %arg3[%c0_3, %c0_4] : memref<1x64xbf16, #tpu.memory_space<vmem>>, vector<1x64xbf16>
    %4 = arith.extf %3 : vector<1x64xbf16> to vector<1x64xf32>
    %5 = vector.broadcast %4 : vector<1x64xf32> to vector<8x64xf32>
    %6 = arith.addf %2, %5 : vector<8x64xf32>
    %cst_5 = arith.constant 0.000000e+00 : f32
    %7 = vector.broadcast %cst_5 : f32 to vector<8x64xf32>
    %8 = arith.maximumf %6, %7 : vector<8x64xf32>
    %9 = arith.truncf %8 : vector<8x64xf32> to vector<8x64xbf16>
    %c0_6 = arith.constant 0 : index
    %c0_7 = arith.constant 0 : index
    %10 = vector.load %arg4[%c0_6, %c0_7] : memref<64x64xbf16, #tpu.memory_space<vmem>>, vector<64x64xbf16>
    %cst_8 = arith.constant dense<0.000000e+00> : vector<8x64xf32>
    %11 = tpu.matmul %9, %10, %cst_8 {dimension_numbers = #tpu.dot_dimension_numbers<[1], [0], [0], [1], [0, 0, 1, 1], [], []>} : vector<8x64xbf16>, vector<64x64xbf16>, vector<8x64xf32> -> vector<8x64xf32>
    %c0_9 = arith.constant 0 : index
    %c0_10 = arith.constant 0 : index
    %12 = vector.load %arg5[%c0_9, %c0_10] : memref<1x64xbf16, #tpu.memory_space<vmem>>, vector<1x64xbf16>
    %13 = arith.extf %12 : vector<1x64xbf16> to vector<1x64xf32>
    %14 = vector.broadcast %13 : vector<1x64xf32> to vector<8x64xf32>
    %15 = arith.addf %11, %14 : vector<8x64xf32>
    %cst_11 = arith.constant 0.000000e+00 : f32
    %16 = vector.broadcast %cst_11 : f32 to vector<8x64xf32>
    %17 = arith.maximumf %15, %16 : vector<8x64xf32>
    %18 = arith.truncf %17 : vector<8x64xf32> to vector<8x64xbf16>
    %c0_12 = arith.constant 0 : index
    %c0_13 = arith.constant 0 : index
    %19 = vector.load %arg6[%c0_12, %c0_13] : memref<64x64xbf16, #tpu.memory_space<vmem>>, vector<64x64xbf16>
    %cst_14 = arith.constant dense<0.000000e+00> : vector<8x64xf32>
    %20 = tpu.matmul %18, %19, %cst_14 {dimension_numbers = #tpu.dot_dimension_numbers<[1], [0], [0], [1], [0, 0, 1, 1], [], []>} : vector<8x64xbf16>, vector<64x64xbf16>, vector<8x64xf32> -> vector<8x64xf32>
    %c0_15 = arith.constant 0 : index
    %c0_16 = arith.constant 0 : index
    %21 = vector.load %arg7[%c0_15, %c0_16] : memref<1x64xbf16, #tpu.memory_space<vmem>>, vector<1x64xbf16>
    %22 = arith.extf %21 : vector<1x64xbf16> to vector<1x64xf32>
    %23 = vector.broadcast %22 : vector<1x64xf32> to vector<8x64xf32>
    %24 = arith.addf %20, %23 : vector<8x64xf32>
    %cst_17 = arith.constant 0.000000e+00 : f32
    %25 = vector.broadcast %cst_17 : f32 to vector<8x64xf32>
    %26 = arith.maximumf %24, %25 : vector<8x64xf32>
    %27 = arith.truncf %26 : vector<8x64xf32> to vector<8x64xbf16>
    %c0_18 = arith.constant 0 : index
    %c0_19 = arith.constant 0 : index
    %28 = vector.load %arg8[%c0_18, %c0_19] : memref<64x128xbf16, #tpu.memory_space<vmem>>, vector<64x128xbf16>
    %cst_20 = arith.constant dense<0.000000e+00> : vector<8x128xf32>
    %29 = tpu.matmul %27, %28, %cst_20 {dimension_numbers = #tpu.dot_dimension_numbers<[1], [0], [0], [1], [0, 0, 1, 1], [], []>} : vector<8x64xbf16>, vector<64x128xbf16>, vector<8x128xf32> -> vector<8x128xf32>
    %c0_21 = arith.constant 0 : index
    %c0_22 = arith.constant 0 : index
    %30 = vector.load %arg9[%c0_21, %c0_22] : memref<1x128xbf16, #tpu.memory_space<vmem>>, vector<1x128xbf16>
    %31 = arith.extf %30 : vector<1x128xbf16> to vector<1x128xf32>
    %32 = vector.broadcast %31 : vector<1x128xf32> to vector<8x128xf32>
    %33 = arith.addf %29, %32 : vector<8x128xf32>
    %cst_23 = arith.constant dense<0xFF800000> : vector<8xf32>
    %34 = vector.multi_reduction <maximumf>, %33, %cst_23 [1] : vector<8x128xf32> to vector<8xf32>
    %35 = vector.shape_cast %34 : vector<8xf32> to vector<8x1xf32>
    %36 = vector.broadcast %35 : vector<8x1xf32> to vector<8x128xf32>
    %37 = arith.subf %33, %36 : vector<8x128xf32>
    %38 = math.exp %37 : vector<8x128xf32>
    %cst_24 = arith.constant dense<0.000000e+00> : vector<8xf32>
    %39 = vector.multi_reduction <add>, %38, %cst_24 [1] : vector<8x128xf32> to vector<8xf32>
    %40 = vector.shape_cast %39 : vector<8xf32> to vector<8x1xf32>
    %41 = math.log %40 : vector<8x1xf32>
    %42 = vector.broadcast %41 : vector<8x1xf32> to vector<8x128xf32>
    %43 = arith.subf %37, %42 : vector<8x128xf32>
    %c0_25 = arith.constant 0 : index
    %c0_26 = arith.constant 0 : index
    %44 = vector.load %arg10[%c0_25, %c0_26] : memref<8x128xf32, #tpu.memory_space<vmem>>, vector<8x128xf32>
    tpu.vector_store %arg10[%c0_25, %c0_26], %43 {strides = array<i32>} : memref<8x128xf32, #tpu.memory_space<vmem>>, vector<8x128xf32>,
    return
  }
  func.func @transform_0(%arg0: i32) -> (i32, i32) {
    %c0_i32 = arith.constant 0 : i32
    %c0_i32_0 = arith.constant 0 : i32
    return %arg0, %c0_i32 : i32, i32
  }
  func.func @transform_1(%arg0: i32) -> (i32, i32) {
    %c0_i32 = arith.constant 0 : i32
    %c0_i32_0 = arith.constant 0 : i32
    %c0_i32_1 = arith.constant 0 : i32
    return %c0_i32, %c0_i32_0 : i32, i32
  }
  func.func @transform_2(%arg0: i32) -> (i32, i32) {
    %c0_i32 = arith.constant 0 : i32
    %c0_i32_0 = arith.constant 0 : i32
    %c0_i32_1 = arith.constant 0 : i32
    return %c0_i32, %c0_i32_0 : i32, i32
  }
  func.func @transform_3(%arg0: i32) -> (i32, i32) {
    %c0_i32 = arith.constant 0 : i32
    %c0_i32_0 = arith.constant 0 : i32
    %c0_i32_1 = arith.constant 0 : i32
    return %c0_i32, %c0_i32_0 : i32, i32
  }
  func.func @transform_4(%arg0: i32) -> (i32, i32) {
    %c0_i32 = arith.constant 0 : i32
    %c0_i32_0 = arith.constant 0 : i32
    %c0_i32_1 = arith.constant 0 : i32
    return %c0_i32, %c0_i32_0 : i32, i32
  }
  func.func @transform_5(%arg0: i32) -> (i32, i32) {
    %c0_i32 = arith.constant 0 : i32
    %c0_i32_0 = arith.constant 0 : i32
    %c0_i32_1 = arith.constant 0 : i32
    return %c0_i32, %c0_i32_0 : i32, i32
  }
  func.func @transform_6(%arg0: i32) -> (i32, i32) {
    %c0_i32 = arith.constant 0 : i32
    %c0_i32_0 = arith.constant 0 : i32
    %c0_i32_1 = arith.constant 0 : i32
    return %c0_i32, %c0_i32_0 : i32, i32
  }
  func.func @transform_7(%arg0: i32) -> (i32, i32) {
    %c0_i32 = arith.constant 0 : i32
    %c0_i32_0 = arith.constant 0 : i32
    %c0_i32_1 = arith.constant 0 : i32
    return %c0_i32, %c0_i32_0 : i32, i32
  }
  func.func @transform_8(%arg0: i32) -> (i32, i32) {
    %c0_i32 = arith.constant 0 : i32
    %c0_i32_0 = arith.constant 0 : i32
    %c0_i32_1 = arith.constant 0 : i32
    return %c0_i32, %c0_i32_0 : i32, i32
  }
  func.func @transform_9(%arg0: i32) -> (i32, i32) {
    %c0_i32 = arith.constant 0 : i32
    %c0_i32_0 = arith.constant 0 : i32
    return %arg0, %c0_i32 : i32, i32
  }
}

</mosaic_0001>

<bundles_post_ra>
// kernel: tpu_custom_call.1
= control target key start
LH: loop header
LB: loop body
LE: loop exit
PB: predicated region body
PF: predicated region fallthrough
CT: control target
= control target key end

     0   :  { %v1280_v39 = vmov 0.0   ;;  %vm1281_vm0 = vmmov 0   ;;  %s1595_s0 = inlined_call_operand.vmem [shape: bf16[8,896], index: 0, kind: input, shape index: {}]   ;;  %s1596_s1 = inlined_call_operand.vmem [shape: bf16[896,64], index: 1, kind: input, shape index: {}]   ;;  %s1597_s2 = inlined_call_operand.vmem [shape: bf16[1,64], index: 2, kind: input, shape index: {}]   ;;  %s1598_s3 = inlined_call_operand.vmem [shape: bf16[64,64], index: 3, kind: input, shape index: {}]   ;;  %s1599_s4 = inlined_call_operand.vmem [shape: bf16[1,64], index: 4, kind: input, shape index: {}]   ;;  %s1600_s5 = inlined_call_operand.vmem [shape: bf16[64,64], index: 5, kind: input, shape index: {}]   ;;  %s1601_s6 = inlined_call_operand.vmem [shape: bf16[1,64], index: 6, kind: input, shape index: {}]   ;;  %s1602_s7 = inlined_call_operand.vmem [shape: bf16[64,128], index: 7, kind: input, shape index: {}]   ;;  %s1603_s8 = inlined_call_operand.vmem [shape: bf16[1,128], index: 8, kind: input, shape index: {}]   ;;  %s1604_s9 = inlined_call_operand.hbm [shape: f32[8,128], index: 9, kind: output, shape index: {}]  }
   0x1   :  { %v1179_v0 = vld [vmem:[%s1596_s1 + $0x78] sm:$0xff]   ;;  %v1183_v4 = vld [vmem:[%s1596_s1 + $0x70] sm:$0xff]   ;;  %v1187_v8 = vld [vmem:[%s1596_s1 + $0x68] sm:$0xff]  }
   0x2   :  { %v1180_v1 = vld [vmem:[%s1596_s1 + $0xf8] sm:$0xff]   ;;  %1030 = vmatprep.subr.bf16.mxu0 %v1179_v0  ;;  %v1184_v5 = vld [vmem:[%s1596_s1 + $0xf0] sm:$0xff]   ;;  %v1188_v9 = vld [vmem:[%s1596_s1 + $0xe8] sm:$0xff]  }
   0x3   :  { %v1181_v2 = vld [vmem:[%s1596_s1 + $0x38] sm:$0xff]   ;;  %1052 = vmatprep.subr.bf16.mxu1 %v1180_v1  ;;  %v1185_v6 = vld [vmem:[%s1596_s1 + $0x30] sm:$0xff]   ;;  %v1189_v10 = vld [vmem:[%s1596_s1 + $0x28] sm:$0xff]  }
   0x4   :  { %v1182_v3 = vld [vmem:[%s1596_s1 + $0xb8] sm:$0xff]   ;;  %1031 = vmatpush3.bf16.msra.mxu0 %v1181_v2  ;;  %v1186_v7 = vld [vmem:[%s1596_s1 + $0xb0] sm:$0xff]   ;;  %v1190_v11 = vld [vmem:[%s1596_s1 + $0xa8] sm:$0xff]  }
   0x5   :  { %1053 = vmatpush3.bf16.msra.mxu1 %v1182_v3  ;;  %1032 = vmatprep.subr.bf16.mxu0 %v1183_v4  ;;  %v1191_v12 = vld [vmem:[%s1596_s1 + $0x60] sm:$0xff]   ;;  %v1195_v16 = vld [vmem:[%s1596_s1 + $0x58] sm:$0xff]   ;;  %v1199_v20 = vld [vmem:[%s1596_s1 + $0x50] sm:$0xff]  }
   0x6   :  { %1054 = vmatprep.subr.bf16.mxu1 %v1184_v5  ;;  %v1192_v13 = vld [vmem:[%s1596_s1 + $0xe0] sm:$0xff]   ;;  %v1196_v17 = vld [vmem:[%s1596_s1 + $0xd8] sm:$0xff]   ;;  %v1200_v21 = vld [vmem:[%s1596_s1 + $0xd0] sm:$0xff]  }
   0x7   :  { %v1193_v14 = vld [vmem:[%s1596_s1 + $0x20] sm:$0xff]   ;;  %v1197_v18 = vld [vmem:[%s1596_s1 + $0x18] sm:$0xff]   ;;  %v1201_v22 = vld [vmem:[%s1596_s1 + $0x10] sm:$0xff]  }
   0x8   :  { %1033 = vmatpush3.bf16.msra.mxu0 %v1185_v6  ;;  %v1194_v15 = vld [vmem:[%s1596_s1 + $0xa0] sm:$0xff]   ;;  %v1198_v19 = vld [vmem:[%s1596_s1 + $0x98] sm:$0xff]   ;;  %v1202_v23 = vld [vmem:[%s1596_s1 + $0x90] sm:$0xff]  }
   0x9   :  { %1055 = vmatpush3.bf16.msra.mxu1 %v1186_v7  ;;  %1034 = vmatprep.subr.bf16.mxu0 %v1187_v8  ;;  %v1203_v24 = vld [vmem:[%s1596_s1 + $0x48] sm:$0xff]   ;;  %v1207_v28 = vld [vmem:[%s1596_s1 + $0x40] sm:$0xff]   ;;  %v1215_v38 = vld [vmem:[%s1596_s1 + $0x178] sm:$0xff]  }
   0xa   :  { %1056 = vmatprep.subr.bf16.mxu1 %v1188_v9  ;;  %v1204_v25 = vld [vmem:[%s1596_s1 + $0xc8] sm:$0xff]   ;;  %v1208_v29 = vld [vmem:[%s1596_s1 + $0xc0] sm:$0xff]   ;;  %v1216_v40 = vld [vmem:[%s1596_s1 + $0x138] sm:$0xff]  }
   0xb   :  { %v1205_v26 = vld [vmem:[%s1596_s1 + $0x8] sm:$0xff]   ;;  %v1209_v30 = vld [vmem:[%s1596_s1] sm:$0xff]   ;;  %v1217_v41 = vld [vmem:[%s1596_s1 + $0x1b8] sm:$0xff]  }
   0xc   :  { %1035 = vmatpush3.bf16.msra.mxu0 %v1189_v10  ;;  %v1206_v27 = vld [vmem:[%s1596_s1 + $0x88] sm:$0xff]   ;;  %v1210_v31 = vld [vmem:[%s1596_s1 + $0x80] sm:$0xff]   ;;  %v1218_v42 = vld [vmem:[%s1596_s1 + $0x170] sm:$0xff]  }
   0xd   :  { %1057 = vmatpush3.bf16.msra.mxu1 %v1190_v11  ;;  %1036 = vmatprep.subr.bf16.mxu0 %v1191_v12  ;;  %v34_v32 = vld [vmem:[%s1595_s0] sm:$0xff]  ;;  %v35_v33 = vld [vmem:[%s1595_s0 + $0x8] sm:$0xff]  ;;  %v1219_v43 = vld [vmem:[%s1596_s1 + $0x130] sm:$0xff]  }
   0xe   :  { %1058 = vmatprep.subr.bf16.mxu1 %v1192_v13  ;;  %v952_v34 = vcombine.low %v34_v32, %v34_v32  ;;  %v953_v35 = vcombine.high %v34_v32, %v34_v32  ;;  %v954_v36 = vcombine.low %v35_v33, %v35_v33  ;;  %v955_v37 = vcombine.high %v35_v33, %v35_v33  ;;  %v1220_v44 = vld [vmem:[%s1596_s1 + $0x1b0] sm:$0xff]   ;;  %v1221_v45 = vld [vmem:[%s1596_s1 + $0x168] sm:$0xff]   ;;  %v1224_v48 = vld [vmem:[%s1596_s1 + $0x160] sm:$0xff]  }
   0xf   :  { %v1222_v46 = vld [vmem:[%s1596_s1 + $0x128] sm:$0xff]   ;;  %v1225_v49 = vld [vmem:[%s1596_s1 + $0x120] sm:$0xff]   ;;  %v1227_v51 = vld [vmem:[%s1596_s1 + $0x158] sm:$0xff]  }
  0x10   :  { %1037 = vmatpush3.bf16.msra.mxu0 %v1193_v14  ;;  %549 = vmatprep.mubr.bf16.mxu0 %v953_v35  ;;  %v1223_v47 = vld [vmem:[%s1596_s1 + $0x1a8] sm:$0xff]   ;;  %v1226_v50 = vld [vmem:[%s1596_s1 + $0x1a0] sm:$0xff]   ;;  %v1228_v52 = vld [vmem:[%s1596_s1 + $0x118] sm:$0xff]  }
  0x11   :  { %1059 = vmatpush3.bf16.msra.mxu1 %v1194_v15  ;;  %1038 = vmatprep.subr.bf16.mxu0 %v1195_v16  ;;  %v1229_v53 = vld [vmem:[%s1596_s1 + $0x198] sm:$0xff]   ;;  %v1230_v54 = vld [vmem:[%s1596_s1 + $0x150] sm:$0xff]   ;;  %v1233_v57 = vld [vmem:[%s1596_s1 + $0x148] sm:$0xff]  }
  0x12   :  { %1060 = vmatprep.subr.bf16.mxu1 %v1196_v17  ;;  %589 = vmatprep.mubr.bf16.mxu1 %v955_v37  ;;  %v1231_v55 = vld [vmem:[%s1596_s1 + $0x110] sm:$0xff]   ;;  %v1234_v58 = vld [vmem:[%s1596_s1 + $0x108] sm:$0xff]   ;;  %v1236_v61 = vld [vmem:[%s1596_s1 + $0x140] sm:$0xff]  }
  0x13   :  { %v1232_v56 = vld [vmem:[%s1596_s1 + $0x190] sm:$0xff]   ;;  %v1235_v59 = vld [vmem:[%s1596_s1 + $0x188] sm:$0xff]   ;;  %v1237_v63 = vld [vmem:[%s1596_s1 + $0x100] sm:$0xff]  }
  0x14   :  { %1039 = vmatpush3.bf16.msra.mxu0 %v1197_v18  ;;  %v36_v60 = vld [vmem:[%s1595_s0 + $0x10] sm:$0xff]  ;;  %v1238_v0 = vld [vmem:[%s1596_s1 + $0x180] sm:$0xff]   ;;  %v1241_v1 = vld [vmem:[%s1595_s0 + $0x18] ss:$0 sps:$4 sm:$0xff]  }
  0x15   :  { %1061 = vmatpush3.bf16.msra.mxu1 %v1198_v19  ;;  %1040 = vmatprep.subr.bf16.mxu0 %v1199_v20  ;;  %v957_v62 = vcombine.high %v36_v60, %v36_v60  ;;  %v956_v2 = vcombine.low %v36_v60, %v36_v60 }
  0x16   :  { %1062 = vmatprep.subr.bf16.mxu1 %v1200_v21 }
  0x18   :  { %1041 = vmatpush3.bf16.msra.mxu0 %v1201_v22 }
  0x19   :  { %1063 = vmatpush3.bf16.msra.mxu1 %v1202_v23  ;;  %1042 = vmatprep.subr.bf16.mxu0 %v1203_v24 }
  0x1a   :  { %1064 = vmatprep.subr.bf16.mxu1 %v1204_v25 }
  0x1c   :  { %1043 = vmatpush3.bf16.msra.mxu0 %v1205_v26 }
  0x1d   :  { %1065 = vmatpush3.bf16.msra.mxu1 %v1206_v27  ;;  %1044 = vmatprep.subr.bf16.mxu0 %v1207_v28 }
  0x1e   :  { %1066 = vmatprep.subr.bf16.mxu1 %v1208_v29 }
  0x20   :  { %1045 = vmatpush3.bf16.msra.mxu0 %v1209_v30 }
  0x21   :  { %1067 = vmatpush3.bf16.msra.mxu1 %v1210_v31  ;;  %1074 = vmatprep.subr.bf16.mxu0 %v1215_v38 }
  0x22   :  { %1120 = vmatprep.subr.bf16.mxu1 %v1280_v39 }
  0x23   :  { %550 = vmatmul.mubr.bf16.vlgmr.msra.gmra.mxu0 %v952_v34 }
  0x24   :  { %590 = vmatmul.mubr.bf16.vlgmr.msra.gmra.mxu1 %v954_v36  ;;  %1075 = vmatpush3.bf16.msra.mxu0 %v1216_v40 }
  0x25   :  { %1121 = vmatpush3.bf16.msra.mxu1 %v1217_v41  ;;  %1076 = vmatprep.subr.bf16.mxu0 %v1218_v42 }
  0x26   :  { %1122 = vmatprep.subr.bf16.mxu1 %v1280_v39  ;;  %1136 = vmatprep.mubr.msk.bf16.mxu1 %vm1281_vm0, %v1280_v39 }
  0x27   :  { %629 = vmatprep.mubr.bf16.mxu0 %v957_v62 }
  0x28   :  { %1077 = vmatpush3.bf16.msra.mxu0 %v1219_v43 }
  0x29   :  { %1123 = vmatpush3.bf16.msra.mxu1 %v1220_v44  ;;  %1078 = vmatprep.subr.bf16.mxu0 %v1221_v45 }
  0x2a   :  { %1124 = vmatprep.subr.bf16.mxu1 %v1280_v39 }
  0x2c   :  { %1079 = vmatpush3.bf16.msra.mxu0 %v1222_v46 }
  0x2d   :  { %1125 = vmatpush3.bf16.msra.mxu1 %v1223_v47  ;;  %1080 = vmatprep.subr.bf16.mxu0 %v1224_v48 }
  0x2e   :  { %1126 = vmatprep.subr.bf16.mxu1 %v1280_v39 }
  0x30   :  { %1081 = vmatpush3.bf16.msra.mxu0 %v1225_v49 }
  0x31   :  { %1127 = vmatpush3.bf16.msra.mxu1 %v1226_v50  ;;  %1082 = vmatprep.subr.bf16.mxu0 %v1227_v51 }
  0x32   :  { %1128 = vmatprep.subr.bf16.mxu1 %v1280_v39 }
  0x34   :  { %1083 = vmatpush3.bf16.msra.mxu0 %v1228_v52 }
  0x35   :  { %1129 = vmatpush3.bf16.msra.mxu1 %v1229_v53  ;;  %1084 = vmatprep.subr.bf16.mxu0 %v1230_v54 }
  0x36   :  { %1130 = vmatprep.subr.bf16.mxu1 %v1280_v39 }
  0x38   :  { %1085 = vmatpush3.bf16.msra.mxu0 %v1231_v55 }
  0x39   :  { %1131 = vmatpush3.bf16.msra.mxu1 %v1232_v56  ;;  %1086 = vmatprep.subr.bf16.mxu0 %v1233_v57 }
  0x3a   :  { %1132 = vmatprep.subr.bf16.mxu1 %v1280_v39 }
  0x3c   :  { %1087 = vmatpush3.bf16.msra.mxu0 %v1234_v58 }
  0x3d   :  { %1133 = vmatpush3.bf16.msra.mxu1 %v1235_v59  ;;  %1088 = vmatprep.subr.bf16.mxu0 %v1236_v61 }
  0x3e   :  { %1134 = vmatprep.subr.bf16.mxu1 %v1280_v39 }
  0x40   :  { %1089 = vmatpush3.bf16.msra.mxu0 %v1237_v63 }
  0x41   :  { %14 = vsyncpa [#allocation3], 0  ;;  %1135 = vmatpush3.bf16.msra.mxu1 %v1238_v0  ;;  %1140 = vmatprep.subr.bf16.mxu0 %v1280_v39  ;;  %v1242_v3 = vld [vmem:[%s1598_s3 + $0x18] sm:$0xff]   ;;  %v1243_v4 = vld [vmem:[%s1598_s3 + $0x10] sm:$0xff]   ;;  %v152_v17 = vlaneseq  ;;  %vm717_vm1 = vcmask 523264  }
  0x42   :  { %1152 = vmatprep.subr.bf16.mxu1 %v1280_v39  ;;  %v1244_v5 = vld [vmem:[%s1598_s3 + $0x8] sm:$0xff]   ;;  %v1245_v6 = vld [vmem:[%s1598_s3] sm:$0xff]   ;;  %v1246_v7 = vld [vmem:[%s1600_s5 + $0x18] sm:$0xff]  }
  0x43   :  { %630 = vmatmul.mubr.bf16.vlgmr.msra.gmra.mxu0 %v956_v2  ;;  %v1247_v8 = vld [vmem:[%s1600_s5 + $0x10] sm:$0xff]   ;;  %v153_v18 = vshrl.u32 %v152_v17, 7  ;;  %v150_v19 = vld [vmem:[%s1597_s2] sm:$0x1]  ;;  %v1248_v41 = vld [vmem:[%s1600_s5 + $0x8] sm:$0xff]  }
  0x44   :  { %1137 = vmatmul.mubr.bf16.vlgmr.msra.gmra.mxu1 %v1241_v1  ;;  %1148 = vmatprep.mubr.msk.bf16.mxu0 %vm1281_vm0, %v1280_v39  ;;  %v151_v20 = vunpack.c.l.bf16 %v150_v19  ;;  %v1249_v42 = vld [vmem:[%s1600_s5] sm:$0xff]   ;;  %v1250_v43 = vld [vmem:[%s1602_s7 + $0x18] sm:$0xff]   ;;  %v1251_v44 = vld [vmem:[%s1602_s7 + $0x10] sm:$0xff]  }
  0x45   :  { %1160 = vmatprep.mubr.msk.bf16.mxu1 %vm1281_vm0, %v1280_v39  ;;  %1141 = vmatpush3.bf16.msra.mxu0 %v1242_v3  ;;  %v154_v21 = vsub.s32 0, %v153_v18  ;;  %v687_v45 = vld [vmem:[%s1599_s4] sm:$0x1]  ;;  %v1252_v55 = vld [vmem:[%s1602_s7 + $0x8] sm:$0xff]  }
  0x46   :  { %1142 = vmatprep.subr.bf16.mxu0 %v1280_v39  ;;  %1153 = vmatpush3.bf16.msra.mxu1 %v1246_v7  ;;  %v688_v46 = vunpack.c.l.bf16 %v687_v45  ;;  %v1253_v56 = vld [vmem:[%s1602_s7] sm:$0xff]  }
  0x47   :  { %1154 = vmatprep.subr.bf16.mxu1 %v1280_v39  ;;  %v155_v22 = vrot.slane %v151_v20, %v154_v21  ;;  %v771_v57 = vld [vmem:[%s1601_s6] sm:$0x1]  ;;  %s1282_s6 = smov [#allocation2]  }
  0x48   :  { %v692_v47 = vrot.slane %v688_v46, %v154_v21  ;;  %v772_v58 = vunpack.c.l.bf16 %v771_v57  ;;  %s944_s7 = sshll.u32 %s1282_s6, 4  ;;  %s945_s7 = int_to_ptr.vmem [resolvable:$true] %s944_s7 }
  0x49   :  { %1143 = vmatpush3.bf16.msra.mxu0 %v1243_v4  ;;  %p1263_p1 = scmp.lt.s32.totalorder %s945_s7, %s945_s7 }
  0x4a   :  { %1144 = vmatprep.subr.bf16.mxu0 %v1280_v39  ;;  %1155 = vmatpush3.bf16.msra.mxu1 %v1247_v8  ;;  %v776_v59 = vrot.slane %v772_v58, %v154_v21 }
  0x4b   :  { %1156 = vmatprep.subr.bf16.mxu1 %v1280_v39 }
  0x4d   :  { %1145 = vmatpush3.bf16.msra.mxu0 %v1244_v5 }
  0x4e   :  { %1146 = vmatprep.subr.bf16.mxu0 %v1280_v39  ;;  %1157 = vmatpush3.bf16.msra.mxu1 %v1248_v41 }
  0x4f   :  { %1158 = vmatprep.subr.bf16.mxu1 %v1280_v39 }
  0x51   :  { %1147 = vmatpush3.bf16.msra.mxu0 %v1245_v6 }
  0x52   :  { %1164 = vmatprep.subr.bf16.mxu0 %v1280_v39  ;;  %1159 = vmatpush3.bf16.msra.mxu1 %v1249_v42 }
  0xe3   :  { %v1046_v9 = vpop.f32.mrf.mxu0 }
  0xe4   :  { %v1068_v10 = vpop.f32.mrf.mxu1 }
  0xe5   :  { %v1047_v11 = vpop.f32.mrf.mxu0 }
  0xe6   :  { %v1069_v12 = vpop.f32.mrf.mxu1  ;;  %v1048_v23 = vadd.f32 %v1047_v11, %v1046_v9 }
  0xe7   :  { %v1049_v13 = vpop.f32.mrf.mxu0  ;;  %v1070_v25 = vadd.f32 %v1069_v12, %v1068_v10 }
  0xe8   :  { %v1071_v14 = vpop.f32.mrf.mxu1  ;;  %v552_v24 = vadd.f32 %v1048_v23, %v155_v22 }
  0xe9   :  { %v1050_v15 = vpop.f32.mrf.mxu0 }
  0xea   :  { %v1072_v16 = vpop.f32.mrf.mxu1  ;;  %v592_v29 = vadd.f32 %v1070_v25, %v552_v24 }
 0x103   :  { %v1090_v26 = vpop.f32.mrf.mxu0 }
 0x104   :  { %v671_v27 = vpop.f32.mrf.mxu1 }
 0x105   :  { %v1091_v28 = vpop.f32.mrf.mxu0 }
 0x106   :  { %v1092_v30 = vadd.f32 %v1091_v28, %v1090_v26  ;;  %v1138_v31 = vpop.f32.mrf.mxu1 }
 0x107   :  { %v1093_v32 = vpop.f32.mrf.mxu0 }
 0x108   :  { %v632_v33 = vadd.f32 %v1092_v30, %v592_v29  ;;  %v674_v34 = vpop.f32.mrf.mxu1 }
 0x109   :  { %v1094_v35 = vpop.f32.mrf.mxu0 }
 0x10a   :  { %v672_v36 = vadd.f32 %v671_v27, %v632_v33  ;;  %v1139_v37 = vpop.f32.mrf.mxu1 }
 0x10c   :  { %v677_v38 = vmax.f32 %v672_v36, 0.0 }
 0x10e   :  { %v678_v40 = vpack.c.bf16 %v677_v38, %v677_v38 }
 0x110   :  { %1149 = vmatmul.mubr.msk.bf16.vlgmr.msra.gmra.mxu0 %vm717_vm1, %v678_v40 }
 0x111   :  { %1172 = vmatprep.mubr.msk.bf16.mxu0 %vm1281_vm0, %v1280_v39  ;;  %1165 = vmatpush3.bf16.msra.mxu0 %v1250_v43 }
 0x112   :  { %1166 = vmatprep.subr.bf16.mxu0 %v1280_v39 }
 0x115   :  { %1167 = vmatpush3.bf16.msra.mxu0 %v1251_v44 }
 0x116   :  { %1168 = vmatprep.subr.bf16.mxu0 %v1280_v39 }
 0x119   :  { %1169 = vmatpush3.bf16.msra.mxu0 %v1252_v55 }
 0x11a   :  { %1170 = vmatprep.subr.bf16.mxu0 %v1280_v39  ;;  %v854_v39 = vld [vmem:[%s1603_s8] sm:$0x1]  ;;  %s1258_s8 = scalar_lea.vmem %s945_s7, 128 }
 0x11b   :  { %v855_v3 = vunpack.c.l.bf16 %v854_v39  ;;  %p1259_p0 = scmp.ne.s32.totalorder %s945_s7, %s1258_s8  ;;  %p1264_p2 = scmp.lt.s32.totalorder %s1258_s8, %s1258_s8 }
 0x11d   :  { %1171 = vmatpush3.bf16.msra.mxu0 %v1253_v56  ;;  %v859_v4 = vrot.slane %v855_v3, %v154_v21  ;;  %p1265_p3 = por %p1264_p2, %p1263_p1 }
 0x11f   :  { %p1266_p4 = pnand %p1265_p3, %p1259_p0 }
 0x1d0   :  { %v755_v48 = vpop.f32.mrf.mxu0 }
 0x1d1   :  { %v756_v49 = vadd.f32 %v755_v48, %v692_v47 }
 0x1d2   :  { %v1150_v50 = vpop.f32.mrf.mxu0 }
 0x1d3   :  { %v761_v51 = vmax.f32 %v756_v49, 0.0 }
 0x1d4   :  { %v758_v52 = vpop.f32.mrf.mxu0 }
 0x1d5   :  { %v762_v53 = vpack.c.bf16 %v761_v51, %v761_v51 }
 0x1d6   :  { %v1151_v54 = vpop.f32.mrf.mxu0 }
 0x1d7   :  { %1161 = vmatmul.mubr.msk.bf16.vlgmr.msra.gmra.mxu1 %vm717_vm1, %v762_v53 }
 0x297   :  { %v838_v60 = vpop.f32.mrf.mxu1 }
 0x298   :  { %v839_v61 = vadd.f32 %v838_v60, %v776_v59 }
 0x299   :  { %v1162_v62 = vpop.f32.mrf.mxu1 }
 0x29a   :  { %v844_v63 = vmax.f32 %v839_v61, 0.0 }
 0x29b   :  { %v841_v0 = vpop.f32.mrf.mxu1 }
 0x29c   :  { %v845_v1 = vpack.c.bf16 %v844_v63, %v844_v63 }
 0x29d   :  { %v1163_v2 = vpop.f32.mrf.mxu1 }
 0x29e   :  { %1173 = vmatmul.mubr.msk.bf16.vlgmr.msra.gmra.mxu0 %vm717_vm1, %v845_v1 }
 0x35e   :  { %v921_v5 = vpop.f32.mrf.mxu0 }
 0x35f   :  { %v922_v6 = vadd.f32 %v921_v5, %v859_v4 }
 0x360   :  { %v1174_v7 = vpop.f32.mrf.mxu0 }
 0x361   :  { %927 = vmax.xlane.f32.xlu0 %v922_v6 }
 0x362   :  { %v924_v8 = vpop.f32.mrf.mxu0 }
 0x364   :  { %v1175_v9 = vpop.f32.mrf.mxu0 }
 0x3ea   :  { %v928_v10 = vpop.xlane.xlu0 %927 }
 0x3eb   :  { %v929_v11 = vsub.f32 %v922_v6, %v928_v10 }
 0x3ed   :  { %v930_v12 = vmul.f32 1.442695, %v929_v11 }
 0x3ef   :  { %1254 = vpow2.f32 %v930_v12 }
 0x3fc   :  { %v1255_v13 = vpop.eup %1254 }
 0x3fd   :  { %932 = vadd.xlane.f32.xlu0 %v1255_v13 }
 0x486   :  { %v933_v14 = vpop.xlane.xlu0 %932 }
 0x487   :  { %1256 = vlog2.f32 %v933_v14 }
 0x494   :  { %v1257_v15 = vpop.eup %1256 }
 0x495   :  { %v935_v16 = vmul.f32 0.6931472, %v1257_v15 }
 0x497   :  { %v936_v17 = vsub.f32 %v929_v11, %v935_v16 }
 0x499   :  { %937 = vst [vmem:[#allocation2] sm:$0xff] %v936_v17 }
 0x49a   :  { %1269 = shalt.err (!%p1266_p4)
}
 0x49b   :  { %947 = dma.vmem_to_hbm [thread:$0]  %s945_s7, 128, %s1604_s9, [#allocation3]  }
 0x49c   :  { %1278 = dma.done.wait [#allocation3], 128  }
 0x49d   :  { %1279 = vsyncadd [#allocation3], 4294967168 }
 0x49e   :  { %951 = vsyncpa [#allocation3], 1 }

</bundles_post_ra>
